<compile_context>
chip_gen: v5e
topology: v5e:2x2
jax: 0.10.0
libtpu: 0.0.40
codegen_flags: <defaults>
</compile_context>

<pallas_src>
import numpy as np

import jax
import jax.numpy as jnp
from jax.experimental import pallas as pl
from jax.experimental.pallas import tpu as pltpu

IN_FEATS = 28 * 28   # 784
HIDDEN = 64
OUT = 10
H_PAD = 128          # lane-dense hidden width
O_PAD = 128          # lane-dense logit width
NEG_BIG = -1e30      # masks padded logit columns out of the log-softmax


def mlp_kernel(x_ref, w1_ref, w234_ref, b_ref, o_ref):
    # x:    (TB, 784)      bf16 (or f32; cast below is a no-op for bf16)
    # w1:   (784, 128)     bf16 (cols 64..127 zero)
    # w234: (3, 128, 128)  bf16 (padded rows/cols zero)
    # b:    (4, 128)       f32  (b4 padded cols = -1e30)
    b = b_ref[...]

    # layer 1: bf16 MXU matmul, f32 accumulation, f32 elementwise
    h = jnp.dot(x_ref[...].astype(jnp.bfloat16), w1_ref[...],
                preferred_element_type=jnp.float32) + b[0:1]
    h = jnp.maximum(h, 0.0)

    # layers 2 and 3
    for l in range(2):
        h = jnp.dot(h.astype(jnp.bfloat16), w234_ref[l],
                    preferred_element_type=jnp.float32) + b[l + 1:l + 2]
        h = jnp.maximum(h, 0.0)

    # layer 4: padded logit columns carry a -1e30 bias -> exp underflows to 0,
    # so the LSE is exact over the 10 real classes.
    logits = jnp.dot(h.astype(jnp.bfloat16), w234_ref[2],
                     preferred_element_type=jnp.float32) + b[3:4]

    # numerically stable log_softmax over the feature axis (lane-dense store)
    m = jnp.max(logits, axis=-1, keepdims=True)
    shifted = logits - m
    lse = jnp.log(jnp.sum(jnp.exp(shifted), axis=-1, keepdims=True))
    o_ref[...] = (shifted - lse).astype(o_ref.dtype)


def pack_params(params):
    """Pad + fuse the float32 (in, out) weights/biases into kernel-ready slabs."""
    w1, b1, w2, b2, w3, b3, w4, b4 = params

    w1p = (jnp.zeros((IN_FEATS, H_PAD), jnp.bfloat16)
           .at[:, :HIDDEN].set(w1.astype(jnp.bfloat16)))

    def pad_sq(w):
        return (jnp.zeros((H_PAD, O_PAD), jnp.bfloat16)
                .at[:w.shape[0], :w.shape[1]].set(w.astype(jnp.bfloat16)))

    w234p = jnp.stack([pad_sq(w2), pad_sq(w3), pad_sq(w4)])  # (3,128,128) bf16

    def pad_b(bias, fill):
        full = jnp.full((O_PAD,), fill, jnp.float32)
        return full.at[:bias.shape[-1]].set(bias.reshape(-1).astype(jnp.float32))

    bp = jnp.stack([pad_b(b1, 0.0), pad_b(b2, 0.0),
                    pad_b(b3, 0.0), pad_b(b4, NEG_BIG)])     # (4,128) f32
    return w1p, w234p, bp


def _round_up(a, m):
    return -(-a // m) * m


def net_forward(x, packed, *, batch_tile=2048, out_dtype=jnp.bfloat16,
                slice_output=True):
    w1p, w234p, bp = packed
    B = x.shape[0]
    x_itemsize = np.dtype(x.dtype).itemsize
    o_itemsize = np.dtype(out_dtype).itemsize

    # v5e guidance: if x is still f32, cap the tile so double-buffered x fits
    # the default scoped VMEM comfortably; bf16 x at 2048 fits everywhere.
    eff_tile = batch_tile if x_itemsize <= 2 else min(batch_tile, 1024)

    if B <= eff_tile:
        Bp8 = _round_up(B, 8)
        if Bp8 >= 256:
            # v7x: make >=2 batch tiles so both TensorCores shard the grid.
            TB = _round_up(-(-Bp8 // 2), 8)
        else:
            TB = Bp8
    else:
        TB = eff_tile
    Bp = _round_up(B, TB)
    if Bp != B:
        x = jnp.pad(x, ((0, Bp - B), (0, 0)))
    grid = (Bp // TB,)

    flops = 2 * Bp * (IN_FEATS * H_PAD + 3 * H_PAD * O_PAD)
    bytes_accessed = (Bp * IN_FEATS * x_itemsize + w1p.size * 2
                      + w234p.size * 2 + bp.size * 4 + Bp * O_PAD * o_itemsize)
    cost = pl.CostEstimate(flops=flops,
                           transcendentals=Bp * (O_PAD + 1),
                           bytes_accessed=bytes_accessed)

    # Explicit VMEM budget: x/out double-buffered, single-buffered weights,
    # plus headroom for f32 activations / compiler temporaries.
    vmem_need = (2 * TB * IN_FEATS * x_itemsize
                 + 2 * TB * O_PAD * o_itemsize
                 + w1p.size * 2 + w234p.size * 2 + bp.size * 4
                 + 4 * TB * O_PAD * 4)
    vmem_limit = int(min(max(vmem_need + (4 << 20), 32 << 20), 64 << 20))

    out = pl.pallas_call(
        mlp_kernel,
        out_shape=jax.ShapeDtypeStruct((Bp, O_PAD), out_dtype),
        grid=grid,
        in_specs=[
            # x: batch-tiled, double-buffered (default)
            pl.BlockSpec((TB, IN_FEATS), lambda i: (i, 0)),
            # weights/biases: constant index maps -> VMEM-resident, single buffer
            pl.BlockSpec((IN_FEATS, H_PAD), lambda i: (0, 0),
                         pipeline_mode=pl.Buffered(1)),
            pl.BlockSpec((3, H_PAD, O_PAD), lambda i: (0, 0, 0),
                         pipeline_mode=pl.Buffered(1)),
            pl.BlockSpec((4, O_PAD), lambda i: (0, 0),
                         pipeline_mode=pl.Buffered(1)),
        ],
        out_specs=pl.BlockSpec((TB, O_PAD), lambda i: (i, 0)),  # lane-dense store
        compiler_params=pltpu.CompilerParams(
            dimension_semantics=("parallel",),      # v7x: 2 TCs share the batch
            vmem_limit_bytes=vmem_limit),
        cost_estimate=cost,
    )(x, w1p, w234p, bp)

    if not slice_output:
        # Padded (Bp, 128) slab; columns >= 10 hold ~-1e30 (= log 0), so NLL /
        # argmax / gather over real classes still work downstream.
        return out
    return out[:B, :OUT]


def init_linear(key, fan_in, fan_out):
    # Mimics PyTorch's default uniform(-1/sqrt(in), 1/sqrt(in)); stored as (in, out).
    kw, kb = jax.random.split(key)
    bound = 1.0 / jnp.sqrt(jnp.float32(fan_in))
    w = jax.random.uniform(kw, (fan_in, fan_out), jnp.float32, -bound, bound)
    b = jax.random.uniform(kb, (1, fan_out), jnp.float32, -bound, bound)
    return w, b


def reference_forward(x, params):
    w1, b1, w2, b2, w3, b3, w4, b4 = params
    h = jax.nn.relu(x @ w1 + b1)
    h = jax.nn.relu(h @ w2 + b2)
    h = jax.nn.relu(h @ w3 + b3)
    logits = h @ w4 + b4
    return jax.nn.log_softmax(logits, axis=1)


if __name__ == "__main__":
    key = jax.random.PRNGKey(0)
    k_x, k1, k2, k3, k4 = jax.random.split(key, 5)

    B = 8  # small batch
    # x is produced / stored upstream as bf16 so the kernel's dominant HBM
    # stream is half-width (no standalone f32->bf16 convert pass).
    x = jax.random.normal(k_x, (B, IN_FEATS), jnp.float32).astype(jnp.bfloat16)

    w1, b1 = init_linear(k1, IN_FEATS, HIDDEN)
    w2, b2 = init_linear(k2, HIDDEN, HIDDEN)
    w3, b3 = init_linear(k3, HIDDEN, HIDDEN)
    w4, b4 = init_linear(k4, HIDDEN, OUT)
    params = (w1, b1, w2, b2, w3, b3, w4, b4)

    packed = pack_params(params)
    out = net_forward(x, packed)
    out = jax.block_until_ready(out)

    ref = reference_forward(x.astype(jnp.float32), params)
    assert out.shape == (B, OUT)
    out_f32 = out.astype(jnp.float32)
    # bf16 weights/inputs/output + f32 accumulation -> small deviation vs. the
    # pure-f32 reference.
    assert jnp.allclose(out_f32, ref, atol=6e-2, rtol=6e-2), "mismatch vs JAX reference"
    # log-softmax rows must (approximately) sum to 1 in prob space
    # (bf16 output rounding widens the tolerance slightly).
    assert jnp.allclose(jnp.sum(jnp.exp(out_f32), axis=1), 1.0, atol=2e-2)

    print("KERNEL_OK")
</pallas_src>

<mosaic_0001>
module attributes {stable_mosaic.version = 11 : i64} {
  func.func @mlp_kernel(%arg0: i32, %arg1: memref<8x784xbf16, #tpu.memory_space<vmem>>, %arg2: memref<784x128xbf16, #tpu.memory_space<vmem>>, %arg3: memref<3x128x128xbf16, #tpu.memory_space<vmem>>, %arg4: memref<4x128xf32, #tpu.memory_space<vmem>>, %arg5: memref<8x128xbf16, #tpu.memory_space<vmem>>) attributes {dimension_semantics = [#tpu.dimension_semantics<parallel>], iteration_bounds = array<i64: 1>, scalar_prefetch = 0 : i64, scratch_operands = 0 : i64, tpu.core_type = #tpu.core_type<tc>, window_params = [{transform_indices = @transform_0, window_bounds = array<i64: 8, 784>}, {pipeline_mode = #tpu.pipeline_mode<synchronous>, transform_indices = @transform_1, window_bounds = array<i64: 784, 128>}, {pipeline_mode = #tpu.pipeline_mode<synchronous>, transform_indices = @transform_2, window_bounds = array<i64: 3, 128, 128>}, {pipeline_mode = #tpu.pipeline_mode<synchronous>, transform_indices = @transform_3, window_bounds = array<i64: 4, 128>}, {transform_indices = @transform_4, window_bounds = array<i64: 8, 128>}]} {
    %c0 = arith.constant 0 : index
    %c0_0 = arith.constant 0 : index
    %0 = vector.load %arg4[%c0, %c0_0] : memref<4x128xf32, #tpu.memory_space<vmem>>, vector<4x128xf32>
    %c0_1 = arith.constant 0 : index
    %c0_2 = arith.constant 0 : index
    %1 = vector.load %arg1[%c0_1, %c0_2] : memref<8x784xbf16, #tpu.memory_space<vmem>>, vector<8x784xbf16>
    %c0_3 = arith.constant 0 : index
    %c0_4 = arith.constant 0 : index
    %2 = vector.load %arg2[%c0_3, %c0_4] : memref<784x128xbf16, #tpu.memory_space<vmem>>, vector<784x128xbf16>
    %cst = arith.constant dense<0.000000e+00> : vector<8x128xf32>
    %3 = tpu.matmul %1, %2, %cst {dimension_numbers = #tpu.dot_dimension_numbers<[1], [0], [0], [1], [0, 0, 1, 1], [], []>} : vector<8x784xbf16>, vector<784x128xbf16>, vector<8x128xf32> -> vector<8x128xf32>
    %4 = vector.extract_strided_slice %0 {offsets = [0, 0], sizes = [1, 128], strides = [1, 1]} : vector<4x128xf32> to vector<1x128xf32>
    %5 = vector.broadcast %4 : vector<1x128xf32> to vector<8x128xf32>
    %6 = arith.addf %3, %5 : vector<8x128xf32>
    %cst_5 = arith.constant 0.000000e+00 : f32
    %7 = vector.broadcast %cst_5 : f32 to vector<8x128xf32>
    %8 = arith.maximumf %6, %7 : vector<8x128xf32>
    %9 = arith.truncf %8 : vector<8x128xf32> to vector<8x128xbf16>
    %c0_6 = arith.constant 0 : index
    %c0_7 = arith.constant 0 : index
    %c0_8 = arith.constant 0 : index
    %10 = vector.load %arg3[%c0_6, %c0_7, %c0_8] : memref<3x128x128xbf16, #tpu.memory_space<vmem>>, vector<1x128x128xbf16>
    %11 = vector.shape_cast %10 : vector<1x128x128xbf16> to vector<128x128xbf16>
    %cst_9 = arith.constant dense<0.000000e+00> : vector<8x128xf32>
    %12 = tpu.matmul %9, %11, %cst_9 {dimension_numbers = #tpu.dot_dimension_numbers<[1], [0], [0], [1], [0, 0, 1, 1], [], []>} : vector<8x128xbf16>, vector<128x128xbf16>, vector<8x128xf32> -> vector<8x128xf32>
    %13 = vector.extract_strided_slice %0 {offsets = [1, 0], sizes = [1, 128], strides = [1, 1]} : vector<4x128xf32> to vector<1x128xf32>
    %14 = vector.broadcast %13 : vector<1x128xf32> to vector<8x128xf32>
    %15 = arith.addf %12, %14 : vector<8x128xf32>
    %cst_10 = arith.constant 0.000000e+00 : f32
    %16 = vector.broadcast %cst_10 : f32 to vector<8x128xf32>
    %17 = arith.maximumf %15, %16 : vector<8x128xf32>
    %18 = arith.truncf %17 : vector<8x128xf32> to vector<8x128xbf16>
    %c1 = arith.constant 1 : index
    %c0_11 = arith.constant 0 : index
    %c0_12 = arith.constant 0 : index
    %19 = vector.load %arg3[%c1, %c0_11, %c0_12] : memref<3x128x128xbf16, #tpu.memory_space<vmem>>, vector<1x128x128xbf16>
    %20 = vector.shape_cast %19 : vector<1x128x128xbf16> to vector<128x128xbf16>
    %cst_13 = arith.constant dense<0.000000e+00> : vector<8x128xf32>
    %21 = tpu.matmul %18, %20, %cst_13 {dimension_numbers = #tpu.dot_dimension_numbers<[1], [0], [0], [1], [0, 0, 1, 1], [], []>} : vector<8x128xbf16>, vector<128x128xbf16>, vector<8x128xf32> -> vector<8x128xf32>
    %22 = vector.extract_strided_slice %0 {offsets = [2, 0], sizes = [1, 128], strides = [1, 1]} : vector<4x128xf32> to vector<1x128xf32>
    %23 = vector.broadcast %22 : vector<1x128xf32> to vector<8x128xf32>
    %24 = arith.addf %21, %23 : vector<8x128xf32>
    %cst_14 = arith.constant 0.000000e+00 : f32
    %25 = vector.broadcast %cst_14 : f32 to vector<8x128xf32>
    %26 = arith.maximumf %24, %25 : vector<8x128xf32>
    %27 = arith.truncf %26 : vector<8x128xf32> to vector<8x128xbf16>
    %c2 = arith.constant 2 : index
    %c0_15 = arith.constant 0 : index
    %c0_16 = arith.constant 0 : index
    %28 = vector.load %arg3[%c2, %c0_15, %c0_16] : memref<3x128x128xbf16, #tpu.memory_space<vmem>>, vector<1x128x128xbf16>
    %29 = vector.shape_cast %28 : vector<1x128x128xbf16> to vector<128x128xbf16>
    %cst_17 = arith.constant dense<0.000000e+00> : vector<8x128xf32>
    %30 = tpu.matmul %27, %29, %cst_17 {dimension_numbers = #tpu.dot_dimension_numbers<[1], [0], [0], [1], [0, 0, 1, 1], [], []>} : vector<8x128xbf16>, vector<128x128xbf16>, vector<8x128xf32> -> vector<8x128xf32>
    %31 = vector.extract_strided_slice %0 {offsets = [3, 0], sizes = [1, 128], strides = [1, 1]} : vector<4x128xf32> to vector<1x128xf32>
    %32 = vector.broadcast %31 : vector<1x128xf32> to vector<8x128xf32>
    %33 = arith.addf %30, %32 : vector<8x128xf32>
    %cst_18 = arith.constant dense<0xFF800000> : vector<8xf32>
    %34 = vector.multi_reduction <maximumf>, %33, %cst_18 [1] : vector<8x128xf32> to vector<8xf32>
    %35 = vector.shape_cast %34 : vector<8xf32> to vector<8x1xf32>
    %36 = vector.broadcast %35 : vector<8x1xf32> to vector<8x128xf32>
    %37 = arith.subf %33, %36 : vector<8x128xf32>
    %38 = math.exp %37 : vector<8x128xf32>
    %cst_19 = arith.constant dense<0.000000e+00> : vector<8xf32>
    %39 = vector.multi_reduction <add>, %38, %cst_19 [1] : vector<8x128xf32> to vector<8xf32>
    %40 = vector.shape_cast %39 : vector<8xf32> to vector<8x1xf32>
    %41 = math.log %40 : vector<8x1xf32>
    %42 = vector.broadcast %41 : vector<8x1xf32> to vector<8x128xf32>
    %43 = arith.subf %37, %42 : vector<8x128xf32>
    %44 = arith.truncf %43 : vector<8x128xf32> to vector<8x128xbf16>
    %c0_20 = arith.constant 0 : index
    %c0_21 = arith.constant 0 : index
    %45 = vector.load %arg5[%c0_20, %c0_21] : memref<8x128xbf16, #tpu.memory_space<vmem>>, vector<8x128xbf16>
    tpu.vector_store %arg5[%c0_20, %c0_21], %44 {strides = array<i32>} : memref<8x128xbf16, #tpu.memory_space<vmem>>, vector<8x128xbf16>,
    return
  }
  func.func @transform_0(%arg0: i32) -> (i32, i32) {
    %c0_i32 = arith.constant 0 : i32
    %c0_i32_0 = arith.constant 0 : i32
    return %arg0, %c0_i32 : i32, i32
  }
  func.func @transform_1(%arg0: i32) -> (i32, i32) {
    %c0_i32 = arith.constant 0 : i32
    %c0_i32_0 = arith.constant 0 : i32
    %c0_i32_1 = arith.constant 0 : i32
    return %c0_i32, %c0_i32_0 : i32, i32
  }
  func.func @transform_2(%arg0: i32) -> (i32, i32, i32) {
    %c0_i32 = arith.constant 0 : i32
    %c0_i32_0 = arith.constant 0 : i32
    %c0_i32_1 = arith.constant 0 : i32
    %c0_i32_2 = arith.constant 0 : i32
    return %c0_i32, %c0_i32_0, %c0_i32_1 : i32, i32, i32
  }
  func.func @transform_3(%arg0: i32) -> (i32, i32) {
    %c0_i32 = arith.constant 0 : i32
    %c0_i32_0 = arith.constant 0 : i32
    %c0_i32_1 = arith.constant 0 : i32
    return %c0_i32, %c0_i32_0 : i32, i32
  }
  func.func @transform_4(%arg0: i32) -> (i32, i32) {
    %c0_i32 = arith.constant 0 : i32
    %c0_i32_0 = arith.constant 0 : i32
    return %arg0, %c0_i32 : i32, i32
  }
}

</mosaic_0001>

<bundles_post_ra>
// kernel: tpu_custom_call.1
= control target key start
LH: loop header
LB: loop body
LE: loop exit
PB: predicated region body
PF: predicated region fallthrough
CT: control target
= control target key end

     0   :  { %9 = vsyncpa [#allocation3], 0  ;;  %s1426_s0 = inlined_call_operand.hbm [shape: bf16[8,784], index: 0, kind: input, shape index: {}]   ;;  %s1427_s1 = inlined_call_operand.hbm [shape: bf16[784,128], index: 1, kind: input, shape index: {}]   ;;  %s1428_s2 = inlined_call_operand.hbm [shape: bf16[3,128,128], index: 2, kind: input, shape index: {}]   ;;  %s1429_s3 = inlined_call_operand.hbm [shape: f32[4,128], index: 3, kind: input, shape index: {}]   ;;  %s1430_s4 = inlined_call_operand.hbm [shape: bf16[8,128], index: 4, kind: output, shape index: {}]  }
   0x1   :  { %10 = vsyncpa [#allocation6], 0 }
   0x2   :  { %11 = vsyncpa [#allocation9], 0  ;;  %s28_s17 = sshll.u32 %s1427_s1, 4  ;;  %s29_s17 = int_to_ptr.hbm [resolvable:$true] %s28_s17 }
   0x3   :  { %12 = vsyncpa [#allocation4], 0  ;;  %s1373_s18 = smov [#allocation5]   ;;  %s18_s22 = sshll.u32 %s1426_s0, 4  ;;  %s19_s22 = int_to_ptr.hbm [resolvable:$true] %s18_s22 }
   0x4   :  { %s30_s19 = sshll.u32 %s1373_s18, 4  ;;  %s1374_s23 = smov 64   ;;  %s31_s19 = int_to_ptr.vmem [resolvable:$true] %s30_s19 }
   0x5   :  { %s1375_s24 = smov 4   ;;  %s1376_s25 = smov [#allocation2]  }
   0x6   :  { %36 = dma.hbm_to_vmem [thread:$0]  %s29_s17, 6272, %s31_s19, [#allocation6], %s1374_s23, %s1374_s23, %s1375_s24  }
   0x7   :  { %s20_s26 = sshll.u32 %s1376_s25, 4  ;;  %s41_s29 = sshll.u32 %s1428_s2, 4  ;;  %s21_s26 = int_to_ptr.vmem [resolvable:$true] %s20_s26  ;;  %s42_s29 = int_to_ptr.hbm [resolvable:$true] %s41_s29 }
   0x8   :  { %23 = dma.hbm_to_vmem [thread:$0]  %s19_s22, 448, %s21_s26, [#allocation3]  }
   0x9   :  { %s55_s5 = sshll.u32 %s1429_s3, 4  ;;  %s1377_s6 = smov [#allocation7]   ;;  %s56_s5 = int_to_ptr.hbm [resolvable:$true] %s55_s5 }
   0xa   :  { %s43_s7 = sshll.u32 %s1377_s6, 4  ;;  %s1378_s0 = smov [#allocation8]   ;;  %s44_s7 = int_to_ptr.vmem [resolvable:$true] %s43_s7 }
   0xb   :  { %49 = dma.hbm_to_vmem [thread:$0]  %s42_s29, 3072, %s44_s7, [#allocation6], %s1374_s23, %s1374_s23, %s1375_s24  }
   0xc   :  { %s57_s8 = sshll.u32 %s1378_s0, 4  ;;  %s58_s8 = int_to_ptr.vmem [resolvable:$true] %s57_s8 }
   0xd   :  { %60 = dma.hbm_to_vmem [thread:$0]  %s56_s5, 64, %s58_s8, [#allocation9]  }
   0xe   :  { %1365 = dma.done.wait [#allocation3], 448  }
   0xf   :  { %1366 = vsyncadd [#allocation3], 4294966848 }
  0x10   :  { %1367 = dma.done.wait [#allocation6], 9344  }
  0x11   :  { %1368 = vsyncadd [#allocation6], 4294957952 }
  0x12   :  { %1369 = dma.done.wait [#allocation9], 64  }
  0x13   :  { %1370 = vsyncadd [#allocation9], 4294967232  ;;  %v1168_v0 = vld [vmem:[#allocation5 + $0x38] sm:$0xff]  ;;  %v1167_v3 = vld [vmem:[#allocation5 + $0x30] sm:$0xff]  ;;  %vm500_vm0 = vcmask 130048   ;;  %s1379_s2 = smov [#allocation10]  }
  0x14   :  { %v1176_v1 = vld [vmem:[#allocation5 + $0x78] sm:$0xff]  ;;  %504 = vmatpush.bf16.msra.mxu0 %v1168_v0  ;;  %v1175_v4 = vld [vmem:[#allocation5 + $0x70] sm:$0xff]  ;;  %v1166_v8 = vld [vmem:[#allocation5 + $0x28] sm:$0xff]  ;;  %s854_s3 = sshll.u32 %s1379_s2, 4  ;;  %s856_s11 = sshll.u32 %s1430_s4, 4  ;;  %s855_s3 = int_to_ptr.vmem [resolvable:$true] %s854_s3  ;;  %s857_s11 = int_to_ptr.hbm [resolvable:$true] %s856_s11 }
  0x15   :  { %v1184_v2 = vld [vmem:[#allocation5 + $0xb8] sm:$0xff]  ;;  %517 = vmatpush.bf16.msra.mxu1 %v1176_v1  ;;  %v1183_v5 = vld [vmem:[#allocation5 + $0xb0] sm:$0xff]  ;;  %v1174_v9 = vld [vmem:[#allocation5 + $0x68] sm:$0xff] }
  0x16   :  { %530 = vmatpush.bf16.msra.mxu2 %v1184_v2  ;;  %v1192_v6 = vld [vmem:[#allocation5 + $0xf8] sm:$0xff]  ;;  %v1191_v7 = vld [vmem:[#allocation5 + $0xf0] sm:$0xff]  ;;  %v1182_v10 = vld [vmem:[#allocation5 + $0xa8] sm:$0xff] }
  0x17   :  { %543 = vmatpush.bf16.msra.mxu3 %v1192_v6  ;;  %v1190_v11 = vld [vmem:[#allocation5 + $0xe8] sm:$0xff]  ;;  %v1165_v12 = vld [vmem:[#allocation5 + $0x20] sm:$0xff]  ;;  %v1164_v16 = vld [vmem:[#allocation5 + $0x18] sm:$0xff] }
  0x18   :  { %505 = vmatpush.bf16.msra.mxu0 %v1167_v3  ;;  %v1173_v13 = vld [vmem:[#allocation5 + $0x60] sm:$0xff]  ;;  %v1172_v17 = vld [vmem:[#allocation5 + $0x58] sm:$0xff]  ;;  %v1163_v20 = vld [vmem:[#allocation5 + $0x10] sm:$0xff] }
  0x19   :  { %518 = vmatpush.bf16.msra.mxu1 %v1175_v4  ;;  %v1181_v14 = vld [vmem:[#allocation5 + $0xa0] sm:$0xff]  ;;  %v1180_v18 = vld [vmem:[#allocation5 + $0x98] sm:$0xff]  ;;  %v1171_v21 = vld [vmem:[#allocation5 + $0x50] sm:$0xff] }
  0x1a   :  { %531 = vmatpush.bf16.msra.mxu2 %v1183_v5  ;;  %v1189_v15 = vld [vmem:[#allocation5 + $0xe0] sm:$0xff]  ;;  %v1188_v19 = vld [vmem:[#allocation5 + $0xd8] sm:$0xff]  ;;  %v1179_v22 = vld [vmem:[#allocation5 + $0x90] sm:$0xff] }
  0x1b   :  { %544 = vmatpush.bf16.msra.mxu3 %v1191_v7  ;;  %v1187_v23 = vld [vmem:[#allocation5 + $0xd0] sm:$0xff]  ;;  %v1162_v24 = vld [vmem:[#allocation5 + $0x8] sm:$0xff]  ;;  %v1161_v32 = vld [vmem:[#allocation5] sm:$0xff] }
  0x1c   :  { %506 = vmatpush.bf16.msra.mxu0 %v1166_v8  ;;  %v1170_v25 = vld [vmem:[#allocation5 + $0x48] sm:$0xff]  ;;  %v1169_v33 = vld [vmem:[#allocation5 + $0x40] sm:$0xff]  ;;  %v1200_v34 = vld [vmem:[#allocation5 + $0x138] sm:$0xff] }
  0x1d   :  { %519 = vmatpush.bf16.msra.mxu1 %v1174_v9  ;;  %v79_v26 = vld [vmem:[#allocation2] sm:$0xff]  ;;  %v80_v28 = vld [vmem:[#allocation2 + $0x8] sm:$0xff]  ;;  %v1208_v35 = vld [vmem:[#allocation5 + $0x178] sm:$0xff] }
  0x1e   :  { %532 = vmatpush.bf16.msra.mxu2 %v1182_v10  ;;  %v1178_v27 = vld [vmem:[#allocation5 + $0x88] sm:$0xff]  ;;  %v186_v29 = vunpack.c.l.b16 %v79_v26  ;;  %v187_v31 = vunpack.c.h.b16 %v79_v26  ;;  %v1177_v36 = vld [vmem:[#allocation5 + $0x80] sm:$0xff]  ;;  %v188_v37 = vunpack.c.l.b16 %v80_v28  ;;  %v189_v40 = vunpack.c.h.b16 %v80_v28  ;;  %v1199_v43 = vld [vmem:[#allocation5 + $0x130] sm:$0xff] }
  0x1f   :  { %545 = vmatpush.bf16.msra.mxu3 %v1190_v11  ;;  %v1186_v30 = vld [vmem:[#allocation5 + $0xc8] sm:$0xff]  ;;  %v1185_v41 = vld [vmem:[#allocation5 + $0xc0] sm:$0xff]  ;;  %v1207_v44 = vld [vmem:[#allocation5 + $0x170] sm:$0xff] }
  0x20   :  { %507 = vmatpush.bf16.msra.mxu0 %v1165_v12  ;;  %v193_v38 = vpack.c.b16 %v186_v29, %v186_v29  ;;  %v194_v39 = vpack.c.b16 %v187_v31, %v187_v31  ;;  %v1209_v42 = vld [vmem:[#allocation5 + $0x180] sm:$0xff]  ;;  %v195_v45 = vpack.c.b16 %v188_v37, %v188_v37  ;;  %v196_v46 = vpack.c.b16 %v189_v40, %v189_v40  ;;  %v1198_v47 = vld [vmem:[#allocation5 + $0x128] sm:$0xff]  ;;  %v82_v51 = vld [vmem:[#allocation2 + $0x18] sm:$0xf] }
  0x21   :  { %520 = vmatpush.bf16.msra.mxu1 %v1173_v13  ;;  %v1206_v48 = vld [vmem:[#allocation5 + $0x168] sm:$0xff]  ;;  %v1197_v49 = vld [vmem:[#allocation5 + $0x120] sm:$0xff]  ;;  %v1196_v52 = vld [vmem:[#allocation5 + $0x118] sm:$0xff]  ;;  %v192_v54 = vunpack.c.l.b16 %v82_v51 }
  0x22   :  { %533 = vmatpush.bf16.msra.mxu2 %v1181_v14  ;;  %v1205_v50 = vld [vmem:[#allocation5 + $0x160] sm:$0xff]  ;;  %v1204_v53 = vld [vmem:[#allocation5 + $0x158] sm:$0xff]  ;;  %v1195_v55 = vld [vmem:[#allocation5 + $0x110] sm:$0xff] }
  0x23   :  { %546 = vmatpush.bf16.msra.mxu3 %v1189_v15  ;;  %v1203_v56 = vld [vmem:[#allocation5 + $0x150] sm:$0xff]  ;;  %v199_v57 = vpack.c.b16 %v192_v54, %v192_v54  ;;  %v1194_v58 = vld [vmem:[#allocation5 + $0x108] sm:$0xff]  ;;  %v1193_v63 = vld [vmem:[#allocation5 + $0x100] sm:$0xff] }
  0x24   :  { %508 = vmatpush.bf16.msra.mxu0 %v1164_v16  ;;  %v1202_v59 = vld [vmem:[#allocation5 + $0x148] sm:$0xff]  ;;  %v81_v60 = vld [vmem:[#allocation2 + $0x10] sm:$0xff]  ;;  %v1201_v0 = vld [vmem:[#allocation5 + $0x140] sm:$0xff] }
  0x25   :  { %521 = vmatpush.bf16.msra.mxu1 %v1172_v17  ;;  %v190_v61 = vunpack.c.l.b16 %v81_v60  ;;  %v191_v62 = vunpack.c.h.b16 %v81_v60  ;;  %v1217_v3 = vld [vmem:[#allocation7 + $0x38] sm:$0xff]  ;;  %v1216_v4 = vld [vmem:[#allocation7 + $0x30] sm:$0xff]  ;;  %v1215_v5 = vld [vmem:[#allocation7 + $0x28] sm:$0xff] }
  0x26   :  { %534 = vmatpush.bf16.msra.mxu2 %v1180_v18  ;;  %v1214_v6 = vld [vmem:[#allocation7 + $0x20] sm:$0xff]  ;;  %v1213_v7 = vld [vmem:[#allocation7 + $0x18] sm:$0xff]  ;;  %v1212_v8 = vld [vmem:[#allocation7 + $0x10] sm:$0xff] }
  0x27   :  { %547 = vmatpush.bf16.msra.mxu3 %v1188_v19  ;;  %v197_v1 = vpack.c.b16 %v190_v61, %v190_v61  ;;  %v198_v2 = vpack.c.b16 %v191_v62, %v191_v62  ;;  %v1211_v9 = vld [vmem:[#allocation7 + $0x8] sm:$0xff]  ;;  %v1210_v12 = vld [vmem:[#allocation7] sm:$0xff]  ;;  %v1225_v15 = vld [vmem:[#allocation7 + $0x78] sm:$0xff] }
  0x28   :  { %509 = vmatpush.bf16.msra.mxu0 %v1163_v20  ;;  %v1417_v16 = vld [vmem:[#allocation8] sm:$0xf]  ;;  %v1224_v19 = vld [vmem:[#allocation7 + $0x70] sm:$0xff] }
  0x29   :  { %522 = vmatpush.bf16.msra.mxu1 %v1171_v21  ;;  %v181_v20 = vperm.slane %v1417_v16, 0  ;;  %v1223_v21 = vld [vmem:[#allocation7 + $0x68] sm:$0xff] }
  0x2a   :  { %535 = vmatpush.bf16.msra.mxu2 %v1179_v22 }
  0x2b   :  { %548 = vmatpush.bf16.msra.mxu3 %v1187_v23 }
  0x2c   :  { %510 = vmatpush.bf16.msra.mxu0 %v1162_v24 }
  0x2d   :  { %523 = vmatpush.bf16.msra.mxu1 %v1170_v25  ;;  %v1222_v25 = vld [vmem:[#allocation7 + $0x60] sm:$0xff] }
  0x2e   :  { %536 = vmatpush.bf16.msra.mxu2 %v1178_v27  ;;  %v1221_v27 = vld [vmem:[#allocation7 + $0x58] sm:$0xff] }
  0x2f   :  { %549 = vmatpush.bf16.msra.mxu3 %v1186_v30  ;;  %v1220_v30 = vld [vmem:[#allocation7 + $0x50] sm:$0xff] }
  0x30   :  { %511 = vmatpush.bf16.msra.mxu0 %v1161_v32 }
  0x31   :  { %524 = vmatpush.bf16.msra.mxu1 %v1169_v33 }
  0x32   :  { %537 = vmatpush.bf16.msra.mxu2 %v1177_v36 }
  0x33   :  { %512 = vmatmul.bf16.vlgmr.msra.gmra.mxu0 %v193_v38  ;;  %550 = vmatpush.bf16.msra.mxu3 %v1185_v41 }
  0x34   :  { %556 = vmatpush.bf16.msrb.mxu0 %v1200_v34  ;;  %525 = vmatmul.bf16.vlgmr.msra.gmra.mxu1 %v194_v39 }
  0x35   :  { %569 = vmatpush.bf16.msrb.mxu1 %v1208_v35  ;;  %538 = vmatmul.bf16.vlgmr.msra.gmra.mxu2 %v195_v45  ;;  %v1232_v45 = vld [vmem:[#allocation7 + $0xb0] sm:$0xff] }
  0x36   :  { %589 = vmatpush.bf16.msrb.mxu2 %v1209_v42  ;;  %551 = vmatmul.bf16.vlgmr.msra.gmra.mxu3 %v196_v46  ;;  %v1219_v42 = vld [vmem:[#allocation7 + $0x48] sm:$0xff] }
  0x37   :  { %662 = vmatpush.bf16.msrb.mxu3 %v1217_v3  ;;  %v1231_v46 = vld [vmem:[#allocation7 + $0xa8] sm:$0xff] }
  0x38   :  { %557 = vmatpush.bf16.msrb.mxu0 %v1199_v43  ;;  %v1218_v43 = vld [vmem:[#allocation7 + $0x40] sm:$0xff] }
  0x39   :  { %570 = vmatpush.bf16.msrb.mxu1 %v1207_v44  ;;  %v1233_v44 = vld [vmem:[#allocation7 + $0xb8] sm:$0xff] }
  0x3a   :  { %743 = vmatpush.bf16.msra.mxu2 %v1225_v15 }
  0x3b   :  { %663 = vmatpush.bf16.msrb.mxu3 %v1216_v4 }
  0x3c   :  { %558 = vmatpush.bf16.msrb.mxu0 %v1198_v47  ;;  %v1230_v47 = vld [vmem:[#allocation7 + $0xa0] sm:$0xff] }
  0x3d   :  { %571 = vmatpush.bf16.msrb.mxu1 %v1206_v48  ;;  %v1229_v48 = vld [vmem:[#allocation7 + $0x98] sm:$0xff] }
  0x3e   :  { %744 = vmatpush.bf16.msra.mxu2 %v1224_v19 }
  0x3f   :  { %664 = vmatpush.bf16.msrb.mxu3 %v1215_v5 }
  0x40   :  { %559 = vmatpush.bf16.msrb.mxu0 %v1197_v49  ;;  %v1228_v49 = vld [vmem:[#allocation7 + $0x90] sm:$0xff] }
  0x41   :  { %572 = vmatpush.bf16.msrb.mxu1 %v1205_v50  ;;  %v613_v50 = vperm.slane %v1417_v16, 1 }
  0x42   :  { %745 = vmatpush.bf16.msra.mxu2 %v1223_v21 }
  0x43   :  { %665 = vmatpush.bf16.msrb.mxu3 %v1214_v6 }
  0x44   :  { %560 = vmatpush.bf16.msrb.mxu0 %v1196_v52 }
  0x45   :  { %573 = vmatpush.bf16.msrb.mxu1 %v1204_v53  ;;  %1064 = vmatmul.msk.bf16.vlgmr.msrb.gmra.mxu2 %vm500_vm0, %v199_v57  ;;  %v1226_v57 = vld [vmem:[#allocation7 + $0x80] sm:$0xff] }
  0x46   :  { %746 = vmatpush.bf16.msra.mxu2 %v1222_v25 }
  0x47   :  { %666 = vmatpush.bf16.msrb.mxu3 %v1213_v7 }
  0x48   :  { %561 = vmatpush.bf16.msrb.mxu0 %v1195_v55 }
  0x49   :  { %574 = vmatpush.bf16.msrb.mxu1 %v1203_v56  ;;  %v1227_v56 = vld [vmem:[#allocation7 + $0x88] sm:$0xff] }
  0x4a   :  { %747 = vmatpush.bf16.msra.mxu2 %v1221_v27 }
  0x4b   :  { %667 = vmatpush.bf16.msrb.mxu3 %v1212_v8 }
  0x4c   :  { %562 = vmatpush.bf16.msrb.mxu0 %v1194_v58  ;;  %v694_v58 = vperm.slane %v1417_v16, 2 }
  0x4d   :  { %575 = vmatpush.bf16.msrb.mxu1 %v1202_v59 }
  0x4e   :  { %748 = vmatpush.bf16.msra.mxu2 %v1220_v30 }
  0x4f   :  { %668 = vmatpush.bf16.msrb.mxu3 %v1211_v9 }
  0x50   :  { %563 = vmatpush.bf16.msrb.mxu0 %v1193_v63 }
  0x51   :  { %576 = vmatpush.bf16.msrb.mxu1 %v1201_v0  ;;  %v775_v0 = vperm.slane %v1417_v16, 3 }
  0x52   :  { %749 = vmatpush.bf16.msra.mxu2 %v1219_v42 }
  0x53   :  { %564 = vmatmul.bf16.vlgmr.msrb.gmra.mxu0 %v197_v1  ;;  %669 = vmatpush.bf16.msrb.mxu3 %v1210_v12 }
  0x54   :  { %577 = vmatmul.bf16.vlgmr.msrb.gmra.mxu1 %v198_v2  ;;  %824 = vmatpush.bf16.msra.mxu0 %v1233_v44 }
  0x56   :  { %750 = vmatpush.bf16.msra.mxu2 %v1218_v43 }
  0x58   :  { %825 = vmatpush.bf16.msra.mxu0 %v1232_v45 }
  0x5c   :  { %826 = vmatpush.bf16.msra.mxu0 %v1231_v46 }
  0x60   :  { %827 = vmatpush.bf16.msra.mxu0 %v1230_v47 }
  0x64   :  { %828 = vmatpush.bf16.msra.mxu0 %v1229_v48 }
  0x68   :  { %829 = vmatpush.bf16.msra.mxu0 %v1228_v49 }
  0x6c   :  { %830 = vmatpush.bf16.msra.mxu0 %v1227_v56 }
  0x70   :  { %831 = vmatpush.bf16.msra.mxu0 %v1226_v57 }
  0xb0   :  { %v513_v10 = vpop.f32.mrf.mxu0 }
  0xb1   :  { %v526_v11 = vpop.f32.mrf.mxu1  ;;  %v514_v22 = vadd.f32 %v513_v10, %v181_v20 }
  0xb3   :  { %v527_v26 = vadd.f32 %v526_v11, %v514_v22 }
  0xb8   :  { %v515_v13 = vpop.f32.mrf.mxu0  ;;  %v539_v17 = vpop.f32.mrf.mxu2 }
  0xb9   :  { %v528_v14 = vpop.f32.mrf.mxu1  ;;  %v552_v18 = vpop.f32.mrf.mxu3  ;;  %v540_v28 = vadd.f32 %v539_v17, %v527_v26 }
  0xbb   :  { %v553_v31 = vadd.f32 %v552_v18, %v540_v28 }
  0xc0   :  { %v541_v23 = vpop.f32.mrf.mxu2 }
  0xc1   :  { %v554_v24 = vpop.f32.mrf.mxu3 }
  0xc8   :  { %v591_v29 = vpop.f32.mrf.mxu2 }
  0xd0   :  { %v565_v32 = vpop.f32.mrf.mxu0  ;;  %v593_v36 = vpop.f32.mrf.mxu2 }
  0xd1   :  { %v578_v33 = vpop.f32.mrf.mxu1  ;;  %v566_v34 = vadd.f32 %v565_v32, %v553_v31 }
  0xd3   :  { %v579_v35 = vadd.f32 %v578_v33, %v566_v34 }
  0xd5   :  { %v592_v37 = vadd.f32 %v591_v29, %v579_v35 }
  0xd7   :  { %v595_v38 = vmax.f32 %v592_v37, 0.0 }
  0xd8   :  { %v567_v39 = vpop.f32.mrf.mxu0 }
  0xd9   :  { %v580_v40 = vpop.f32.mrf.mxu1  ;;  %v596_v41 = vpack.c.bf16 %v595_v38, %v595_v38 }
  0xdb   :  { %670 = vmatmul.bf16.vlgmr.msrb.gmra.mxu3 %v596_v41 }
 0x15e   :  { %v671_v51 = vpop.f32.mrf.mxu3 }
 0x15f   :  { %v672_v52 = vadd.f32 %v671_v51, %v613_v50 }
 0x161   :  { %v675_v53 = vmax.f32 %v672_v52, 0.0 }
 0x163   :  { %v676_v54 = vpack.c.bf16 %v675_v53, %v675_v53 }
 0x165   :  { %751 = vmatmul.bf16.vlgmr.msra.gmra.mxu2 %v676_v54 }
 0x166   :  { %v673_v55 = vpop.f32.mrf.mxu3 }
 0x1e8   :  { %v752_v59 = vpop.f32.mrf.mxu2 }
 0x1e9   :  { %v753_v60 = vadd.f32 %v752_v59, %v694_v58 }
 0x1eb   :  { %v756_v61 = vmax.f32 %v753_v60, 0.0 }
 0x1ed   :  { %v757_v62 = vpack.c.bf16 %v756_v61, %v756_v61 }
 0x1ef   :  { %832 = vmatmul.bf16.vlgmr.msra.gmra.mxu0 %v757_v62 }
 0x1f0   :  { %v754_v63 = vpop.f32.mrf.mxu2 }
 0x26c   :  { %v833_v1 = vpop.f32.mrf.mxu0 }
 0x26d   :  { %v834_v2 = vadd.f32 %v833_v1, %v775_v0 }
 0x26f   :  { %837 = vmax.xlane.f32.xlu0 %v834_v2 }
 0x274   :  { %v835_v3 = vpop.f32.mrf.mxu0 }
 0x2e2   :  { %v838_v4 = vpop.xlane.xlu0 %837 }
 0x2e3   :  { %v839_v5 = vsub.f32 %v834_v2, %v838_v4 }
 0x2e5   :  { %v840_v6 = vmul.f32 1.442695, %v839_v5 }
 0x2e7   :  { %1241 = vpow2.f32 %v840_v6 }
 0x2ed   :  { %v1242_v7 = vpop.eup %1241 }
 0x2ee   :  { %842 = vadd.xlane.f32.xlu0 %v1242_v7 }
 0x361   :  { %v843_v8 = vpop.xlane.xlu0 %842 }
 0x362   :  { %1243 = vlog2.f32 %v843_v8 }
 0x368   :  { %v1244_v9 = vpop.eup %1243 }
 0x369   :  { %v845_v10 = vmul.f32 0.6931472, %v1244_v9 }
 0x36b   :  { %v846_v11 = vsub.f32 %v839_v5, %v845_v10 }
 0x36d   :  { %v847_v12 = vpack.c.bf16 %v846_v11, %v846_v11 }
 0x36f   :  { %848 = vst [vmem:[#allocation10] sm:$0xf] %v847_v12 }
 0x370   :  { %859 = dma.vmem_to_hbm [thread:$0]  %s855_s3, 64, %s857_s11, [#allocation4]  }
 0x371   :  { %1371 = dma.done.wait [#allocation4], 64  }
 0x372   :  { %1372 = vsyncadd [#allocation4], 4294967232 }
 0x373   :  { %864 = vsyncpa [#allocation3], 1 }
 0x374   :  { %865 = vsyncpa [#allocation6], 1 }
 0x375   :  { %866 = vsyncpa [#allocation9], 1 }
 0x376   :  { %867 = vsyncpa [#allocation4], 1 }

</bundles_post_ra>
